<compile_context>
chip_gen: v7x
topology: tpu7x:2x2x1
jax: 0.10.0
libtpu: 0.0.40
codegen_flags: <defaults>
</compile_context>

<pallas_src>
import math
import functools

import jax
import jax.numpy as jnp
from jax.experimental import pallas as pl
from jax.experimental.pallas import tpu as pltpu


def _mha_kernel(x_ref, wqkv_ref, bqkv_ref, wo_ref, bo_ref, o_ref, *,
                num_heads, head_dim):
    H, hd = num_heads, head_dim
    E = H * hd

    x = x_ref[...]                                               # (TB, Din)

    # --- QKV projection: one MXU matmul, f32 accumulation -------------------
    qkv = jnp.dot(x, wqkv_ref[...], preferred_element_type=jnp.float32)
    qkv = qkv + bqkv_ref[...]                                    # (TB, 3E) f32

    TB = qkv.shape[0]
    # Weights were reordered host-side to contiguous [Q | K | V] blocks, so
    # q / k / v are three contiguous column slices (no per-head lane shuffles).
    q = qkv[:, :E].reshape(TB, H, hd)
    k = qkv[:, E:2 * E].reshape(TB, H, hd)
    v = qkv[:, 2 * E:].reshape(TB, H, hd)

    # --- scaled dot-product attention over the head axis (batched einsums) --
    scale = 1.0 / math.sqrt(hd)
    logits = jnp.einsum('bhd,bgd->bhg', q, k,
                        preferred_element_type=jnp.float32) * scale  # (TB,H,H)
    m = jnp.max(logits, axis=-1, keepdims=True)
    e = jnp.exp(logits - m)
    attn = e / jnp.sum(e, axis=-1, keepdims=True)                # softmax, f32
    values = jnp.einsum('bhg,bgd->bhd', attn, v,
                        preferred_element_type=jnp.float32)      # (TB, H, hd)
    values = values.reshape(TB, E).astype(x.dtype)

    # --- output projection (MXU) --------------------------------------------
    o = jnp.dot(values, wo_ref[...], preferred_element_type=jnp.float32)
    o = o + bo_ref[...]
    o_ref[...] = o.astype(o_ref.dtype)


def multihead_attention(x, wqkv, bqkv, wo, bo, *, num_heads, block_b=None):
    """x:(B,Din), wqkv:(Din,3E), bqkv:(1,3E), wo:(E,E), bo:(1,E) -> (B,E)."""
    B, Din = x.shape
    E3 = wqkv.shape[1]
    E = E3 // 3
    head_dim = E // num_heads
    assert E % num_heads == 0

    # Host-side (wrapper, once) column reorder of W_qkv / b_qkv:
    # per-head-interleaved [q_h|k_h|v_h]  ->  contiguous [Q | K | V] blocks.
    perm = jnp.arange(E3).reshape(num_heads, 3, head_dim)
    perm = jnp.transpose(perm, (1, 0, 2)).reshape(E3)
    wqkv_r = wqkv[:, perm]
    bqkv_r = bqkv.reshape(1, E3)[:, perm]

    # Batch tile: single grid step for small problems, otherwise 256-row tiles
    # (MXU-native on v6e/v7x) with pl.cdiv + zero padding for the remainder.
    if block_b is None:
        block_b = B if B <= 256 else 256
    n_blocks = pl.cdiv(B, block_b)
    Bp = n_blocks * block_b
    if Bp != B:
        x = jnp.pad(x, ((0, Bp - B), (0, 0)))

    itemsize = jnp.dtype(x.dtype).itemsize
    cost = pl.CostEstimate(
        flops=(2 * Bp * (Din * E3 + E * E)
               + 4 * Bp * num_heads * num_heads * head_dim),
        transcendentals=Bp * num_heads * num_heads,
        bytes_accessed=int(x.size + wqkv.size + bqkv.size + wo.size + bo.size
                           + Bp * E) * itemsize,
    )

    # Grid-invariant blocks (weights / biases): single buffer is enough.
    const = dict(pipeline_mode=pl.Buffered(1))

    kernel = functools.partial(_mha_kernel, num_heads=num_heads,
                               head_dim=head_dim)
    out = pl.pallas_call(
        kernel,
        out_shape=jax.ShapeDtypeStruct((Bp, E), x.dtype),
        grid_spec=pltpu.PrefetchScalarGridSpec(
            num_scalar_prefetch=0,
            grid=(n_blocks,),                                   # tile over batch
            in_specs=[
                pl.BlockSpec((block_b, Din), lambda i: (i, 0)),           # x
                pl.BlockSpec((Din, E3),      lambda i: (0, 0), **const),  # W_qkv
                pl.BlockSpec((1, E3),        lambda i: (0, 0), **const),  # b_qkv
                pl.BlockSpec((E, E),         lambda i: (0, 0), **const),  # W_o
                pl.BlockSpec((1, E),         lambda i: (0, 0), **const),  # b_o
            ],
            out_specs=pl.BlockSpec((block_b, E), lambda i: (i, 0)),
        ),
        compiler_params=pltpu.CompilerParams(
            dimension_semantics=("parallel",)),
        cost_estimate=cost,
    )(x, wqkv_r, bqkv_r, wo, bo)
    return out[:B]


def _xavier_uniform(key, fan_in, fan_out, shape):
    bound = math.sqrt(6.0 / (fan_in + fan_out))
    return jax.random.uniform(key, shape, jnp.float32, -bound, bound)


def _reference(x, wqkv, bqkv, wo, bo, num_heads):
    """Pure-JAX mirror of the PyTorch forward (original interleaved layout)."""
    B, _ = x.shape
    E = wo.shape[0]
    hd = E // num_heads
    qkv = x @ wqkv + bqkv.reshape(1, -1)                        # (B, 3E)
    qkv = qkv.reshape(B, num_heads, 3 * hd)
    q, k, v = qkv[..., :hd], qkv[..., hd:2 * hd], qkv[..., 2 * hd:]
    logits = jnp.einsum('bhd,bgd->bhg', q, k) / math.sqrt(hd)
    attn = jax.nn.softmax(logits, axis=-1)
    values = jnp.einsum('bhg,bgd->bhd', attn, v).reshape(B, E)
    return values @ wo + bo.reshape(1, -1)


if __name__ == "__main__":
    batch = 16
    input_dim = 32
    embed_dim = 32
    num_heads = 4

    key = jax.random.PRNGKey(0)
    kx, kq, ko = jax.random.split(key, 3)

    # Deterministic parameter init (matches nn.Module shapes; biases zeroed).
    # PyTorch stores Linear weight as (out, in); we keep the transposed (in, out).
    wqkv = _xavier_uniform(kq, input_dim, 3 * embed_dim,
                           (input_dim, 3 * embed_dim))
    bqkv = jnp.zeros((1, 3 * embed_dim), jnp.float32)
    wo = _xavier_uniform(ko, embed_dim, embed_dim, (embed_dim, embed_dim))
    bo = jnp.zeros((1, embed_dim), jnp.float32)

    x = jax.random.normal(kx, (batch, input_dim), jnp.float32)

    out = multihead_attention(x, wqkv, bqkv, wo, bo, num_heads=num_heads)
    out = jax.block_until_ready(out)

    ref = _reference(x, wqkv, bqkv, wo, bo, num_heads)
    assert out.shape == (batch, embed_dim)
    assert jnp.max(jnp.abs(out - ref)) < 1e-4

    print("KERNEL_OK")
</pallas_src>

<mosaic_0001>
module attributes {stable_mosaic.version = 11 : i64} {
  func.func @_mha_kernel(%arg0: i32, %arg1: memref<16x32xf32, #tpu.memory_space<vmem>>, %arg2: memref<32x96xf32, #tpu.memory_space<vmem>>, %arg3: memref<1x96xf32, #tpu.memory_space<vmem>>, %arg4: memref<32x32xf32, #tpu.memory_space<vmem>>, %arg5: memref<1x32xf32, #tpu.memory_space<vmem>>, %arg6: memref<16x32xf32, #tpu.memory_space<vmem>>) attributes {dimension_semantics = [#tpu.dimension_semantics<parallel>], iteration_bounds = array<i64: 1>, scalar_prefetch = 0 : i64, scratch_operands = 0 : i64, tpu.core_type = #tpu.core_type<tc>, window_params = [{transform_indices = @transform_0, window_bounds = array<i64: 16, 32>}, {pipeline_mode = #tpu.pipeline_mode<synchronous>, transform_indices = @transform_1, window_bounds = array<i64: 32, 96>}, {pipeline_mode = #tpu.pipeline_mode<synchronous>, transform_indices = @transform_2, window_bounds = array<i64: 1, 96>}, {pipeline_mode = #tpu.pipeline_mode<synchronous>, transform_indices = @transform_3, window_bounds = array<i64: 32, 32>}, {pipeline_mode = #tpu.pipeline_mode<synchronous>, transform_indices = @transform_4, window_bounds = array<i64: 1, 32>}, {transform_indices = @transform_5, window_bounds = array<i64: 16, 32>}]} {
    %c0 = arith.constant 0 : index
    %c0_0 = arith.constant 0 : index
    %0 = vector.load %arg1[%c0, %c0_0] : memref<16x32xf32, #tpu.memory_space<vmem>>, vector<16x32xf32>
    %c0_1 = arith.constant 0 : index
    %c0_2 = arith.constant 0 : index
    %1 = vector.load %arg2[%c0_1, %c0_2] : memref<32x96xf32, #tpu.memory_space<vmem>>, vector<32x96xf32>
    %cst = arith.constant dense<0.000000e+00> : vector<16x96xf32>
    %2 = tpu.matmul %0, %1, %cst {dimension_numbers = #tpu.dot_dimension_numbers<[1], [0], [0], [1], [0, 0, 1, 1], [], []>} : vector<16x32xf32>, vector<32x96xf32>, vector<16x96xf32> -> vector<16x96xf32>
    %c0_3 = arith.constant 0 : index
    %c0_4 = arith.constant 0 : index
    %3 = vector.load %arg3[%c0_3, %c0_4] : memref<1x96xf32, #tpu.memory_space<vmem>>, vector<1x96xf32>
    %4 = vector.broadcast %3 : vector<1x96xf32> to vector<16x96xf32>
    %5 = arith.addf %2, %4 : vector<16x96xf32>
    %6 = vector.extract_strided_slice %5 {offsets = [0, 0], sizes = [16, 32], strides = [1, 1]} : vector<16x96xf32> to vector<16x32xf32>
    %7 = vector.shape_cast %6 : vector<16x32xf32> to vector<16x4x8xf32>
    %8 = vector.extract_strided_slice %5 {offsets = [0, 32], sizes = [16, 32], strides = [1, 1]} : vector<16x96xf32> to vector<16x32xf32>
    %9 = vector.shape_cast %8 : vector<16x32xf32> to vector<16x4x8xf32>
    %10 = vector.extract_strided_slice %5 {offsets = [0, 64], sizes = [16, 32], strides = [1, 1]} : vector<16x96xf32> to vector<16x32xf32>
    %11 = vector.shape_cast %10 : vector<16x32xf32> to vector<16x4x8xf32>
    "tpu.trace_start"() <{level = 10 : i32, message = "bhd,bgd->bhg"}> : () -> ()
    %cst_5 = arith.constant dense<0.000000e+00> : vector<16x4x4xf32>
    %12 = tpu.matmul %7, %9, %cst_5 {dimension_numbers = #tpu.dot_dimension_numbers<[2], [2], [1], [1], [0, 0, 0, 1, 1, 1], [0], [0]>} : vector<16x4x8xf32>, vector<16x4x8xf32>, vector<16x4x4xf32> -> vector<16x4x4xf32>
    "tpu.trace_stop"() : () -> ()
    %cst_6 = arith.constant 0.353553385 : f32
    %13 = vector.broadcast %cst_6 : f32 to vector<16x4x4xf32>
    %14 = arith.mulf %12, %13 : vector<16x4x4xf32>
    %cst_7 = arith.constant dense<0xFF800000> : vector<16x4xf32>
    %15 = vector.multi_reduction <maximumf>, %14, %cst_7 [2] : vector<16x4x4xf32> to vector<16x4xf32>
    %16 = vector.shape_cast %15 : vector<16x4xf32> to vector<16x4x1xf32>
    %17 = vector.broadcast %16 : vector<16x4x1xf32> to vector<16x4x4xf32>
    %18 = arith.subf %14, %17 : vector<16x4x4xf32>
    %19 = math.exp %18 : vector<16x4x4xf32>
    %cst_8 = arith.constant dense<0.000000e+00> : vector<16x4xf32>
    %20 = vector.multi_reduction <add>, %19, %cst_8 [2] : vector<16x4x4xf32> to vector<16x4xf32>
    %21 = vector.shape_cast %20 : vector<16x4xf32> to vector<16x4x1xf32>
    %22 = vector.broadcast %21 : vector<16x4x1xf32> to vector<16x4x4xf32>
    %23 = arith.divf %19, %22 : vector<16x4x4xf32>
    "tpu.trace_start"() <{level = 10 : i32, message = "bhg,bgd->bhd"}> : () -> ()
    %cst_9 = arith.constant dense<0.000000e+00> : vector<16x4x8xf32>
    %24 = tpu.matmul %23, %11, %cst_9 {dimension_numbers = #tpu.dot_dimension_numbers<[2], [1], [1], [2], [0, 0, 0, 1, 1, 2], [0], [0]>} : vector<16x4x4xf32>, vector<16x4x8xf32>, vector<16x4x8xf32> -> vector<16x4x8xf32>
    "tpu.trace_stop"() : () -> ()
    %25 = vector.shape_cast %24 : vector<16x4x8xf32> to vector<16x32xf32>
    %c0_10 = arith.constant 0 : index
    %c0_11 = arith.constant 0 : index
    %26 = vector.load %arg4[%c0_10, %c0_11] : memref<32x32xf32, #tpu.memory_space<vmem>>, vector<32x32xf32>
    %cst_12 = arith.constant dense<0.000000e+00> : vector<16x32xf32>
    %27 = tpu.matmul %25, %26, %cst_12 {dimension_numbers = #tpu.dot_dimension_numbers<[1], [0], [0], [1], [0, 0, 1, 1], [], []>} : vector<16x32xf32>, vector<32x32xf32>, vector<16x32xf32> -> vector<16x32xf32>
    %c0_13 = arith.constant 0 : index
    %c0_14 = arith.constant 0 : index
    %28 = vector.load %arg5[%c0_13, %c0_14] : memref<1x32xf32, #tpu.memory_space<vmem>>, vector<1x32xf32>
    %29 = vector.broadcast %28 : vector<1x32xf32> to vector<16x32xf32>
    %30 = arith.addf %27, %29 : vector<16x32xf32>
    %c0_15 = arith.constant 0 : index
    %c0_16 = arith.constant 0 : index
    %31 = vector.load %arg6[%c0_15, %c0_16] : memref<16x32xf32, #tpu.memory_space<vmem>>, vector<16x32xf32>
    tpu.vector_store %arg6[%c0_15, %c0_16], %30 {strides = array<i32>} : memref<16x32xf32, #tpu.memory_space<vmem>>, vector<16x32xf32>,
    return
  }
  func.func @transform_0(%arg0: i32) -> (i32, i32) {
    %c0_i32 = arith.constant 0 : i32
    %c0_i32_0 = arith.constant 0 : i32
    return %arg0, %c0_i32 : i32, i32
  }
  func.func @transform_1(%arg0: i32) -> (i32, i32) {
    %c0_i32 = arith.constant 0 : i32
    %c0_i32_0 = arith.constant 0 : i32
    %c0_i32_1 = arith.constant 0 : i32
    return %c0_i32, %c0_i32_0 : i32, i32
  }
  func.func @transform_2(%arg0: i32) -> (i32, i32) {
    %c0_i32 = arith.constant 0 : i32
    %c0_i32_0 = arith.constant 0 : i32
    %c0_i32_1 = arith.constant 0 : i32
    return %c0_i32, %c0_i32_0 : i32, i32
  }
  func.func @transform_3(%arg0: i32) -> (i32, i32) {
    %c0_i32 = arith.constant 0 : i32
    %c0_i32_0 = arith.constant 0 : i32
    %c0_i32_1 = arith.constant 0 : i32
    return %c0_i32, %c0_i32_0 : i32, i32
  }
  func.func @transform_4(%arg0: i32) -> (i32, i32) {
    %c0_i32 = arith.constant 0 : i32
    %c0_i32_0 = arith.constant 0 : i32
    %c0_i32_1 = arith.constant 0 : i32
    return %c0_i32, %c0_i32_0 : i32, i32
  }
  func.func @transform_5(%arg0: i32) -> (i32, i32) {
    %c0_i32 = arith.constant 0 : i32
    %c0_i32_0 = arith.constant 0 : i32
    return %arg0, %c0_i32 : i32, i32
  }
}

</mosaic_0001>

<bundles_post_ra>
// kernel: tpu_custom_call.1
= control target key start
LH: loop header
LB: loop body
LE: loop exit
PB: predicated region body
PF: predicated region fallthrough
CT: control target
= control target key end

     0   :  { %10 = vsyncpa [#allocation3], 0  ;;  %s4706_s0 = inlined_call_operand.hbm [shape: f32[16,32], index: 0, kind: input, shape index: {}]   ;;  %s4707_s1 = inlined_call_operand.hbm [shape: f32[32,96], index: 1, kind: input, shape index: {}]   ;;  %s4708_s2 = inlined_call_operand.vmem [shape: f32[1,96], index: 2, kind: input, shape index: {}]   ;;  %s4709_s3 = inlined_call_operand.hbm [shape: f32[32,32], index: 3, kind: input, shape index: {}]   ;;  %s4710_s4 = inlined_call_operand.vmem [shape: f32[1,32], index: 4, kind: input, shape index: {}]   ;;  %s4711_s5 = inlined_call_operand.hbm [shape: f32[16,32], index: 5, kind: output, shape index: {}]  }
   0x1   :  { %11 = vsyncpa [#allocation6], 0 }
   0x2   :  { %12 = vsyncpa [#allocation4], 0  ;;  %s4060_s18 = smov [#allocation5]   ;;  %s4061_s20 = smov [#allocation2]  }
   0x3   :  { %s30_s19 = sshll.u32 %s4060_s18, 4  ;;  %s18_s21 = sshll.u32 %s4061_s20, 4  ;;  %s31_s19 = int_to_ptr.vmem [resolvable:$true] %s30_s19  ;;  %s4107_s21 = int_to_ptr.vmem [resolvable:$true] %s18_s21 }
   0x4   :  { %s3966_s24 = scalar_lea.hbm %s4707_s1, 512 }
   0x5   :  { %p3967_p0 = scmp.ne.s32.totalorder %s4707_s1, %s3966_s24  ;;  %p3970_p1 = scmp.lt.u32.totalorder %s3966_s24, %s4707_s1 }
   0x7   :  { %p3972_p2 = pnand %p3970_p1, %p3967_p0 }
   0x9   :  { %3975 = shalt.err (!%p3972_p2)
}
   0xa   :  { %s3976_s29 = scalar_lea.vmem %s31_s19, 512  ;;  %p3981_p4 = scmp.lt.s32.totalorder %s31_s19, %s31_s19 }
   0xb   :  { %p3977_p3 = scmp.ne.s32.totalorder %s31_s19, %s3976_s29  ;;  %p3982_p5 = scmp.lt.s32.totalorder %s3976_s29, %s3976_s29 }
   0xd   :  { %p3983_p6 = por %p3982_p5, %p3981_p4 }
   0xf   :  { %p3984_p7 = pnand %p3983_p6, %p3977_p3 }
  0x11   :  { %3987 = shalt.err (!%p3984_p7)
}
  0x12   :  { %s4062_s30 = smov 128   ;;  %s4063_s6 = smov 8  }
  0x13   :  { %36 = dma.hbm_to_vmem [thread:$0]  %s4707_s1, 512, %s31_s19, [#allocation6], %s4062_s30, %s4062_s30, %s4063_s6  }
  0x14   :  { %s3988_s11 = scalar_lea.hbm %s4706_s0, 256 }
  0x15   :  { %p3989_p8 = scmp.ne.s32.totalorder %s4706_s0, %s3988_s11  ;;  %p3992_p9 = scmp.lt.u32.totalorder %s3988_s11, %s4706_s0 }
  0x17   :  { %p3994_p10 = pnand %p3992_p9, %p3989_p8 }
  0x19   :  { %3997 = shalt.err (!%p3994_p10)
}
  0x1a   :  { %s3998_s16 = scalar_lea.vmem %s4107_s21, 256  ;;  %p4003_p12 = scmp.lt.s32.totalorder %s4107_s21, %s4107_s21 }
  0x1b   :  { %p3999_p11 = scmp.ne.s32.totalorder %s4107_s21, %s3998_s16  ;;  %p4004_p13 = scmp.lt.s32.totalorder %s3998_s16, %s3998_s16 }
  0x1d   :  { %p4005_p0 = por %p4004_p13, %p4003_p12 }
  0x1f   :  { %p4006_p1 = pnand %p4005_p0, %p3999_p11 }
  0x21   :  { %4009 = shalt.err (!%p4006_p1)
}
  0x22   :  { %24 = dma.hbm_to_vmem [thread:$0]  %s4706_s0, 256, %s4107_s21, [#allocation3], %s4062_s30, %s4062_s30, %s4063_s6  }
  0x23   :  { %s4064_s18 = smov [#allocation7]   ;;  %s4010_s23 = scalar_lea.hbm %s4709_s3, 512 }
  0x24   :  { %s44_s19 = sshll.u32 %s4064_s18, 4  ;;  %p4011_p2 = scmp.ne.s32.totalorder %s4709_s3, %s4010_s23  ;;  %s45_s19 = int_to_ptr.vmem [resolvable:$true] %s44_s19 }
  0x25   :  { %p4014_p3 = scmp.lt.u32.totalorder %s4010_s23, %s4709_s3 }
  0x27   :  { %p4016_p4 = pnand %p4014_p3, %p4011_p2 }
  0x29   :  { %4019 = shalt.err (!%p4016_p4)
}
  0x2a   :  { %s4020_s28 = scalar_lea.vmem %s45_s19, 512  ;;  %p4025_p6 = scmp.lt.s32.totalorder %s45_s19, %s45_s19 }
  0x2b   :  { %p4021_p5 = scmp.ne.s32.totalorder %s45_s19, %s4020_s28  ;;  %p4026_p7 = scmp.lt.s32.totalorder %s4020_s28, %s4020_s28 }
  0x2d   :  { %p4027_p8 = por %p4026_p7, %p4025_p6 }
  0x2f   :  { %p4028_p9 = pnand %p4027_p8, %p4021_p5 }
  0x31   :  { %4031 = shalt.err (!%p4028_p9)
}
  0x32   :  { %50 = dma.hbm_to_vmem [thread:$0]  %s4709_s3, 512, %s45_s19, [#allocation6], %s4062_s30, %s4062_s30, %s4063_s6  }
  0x33   :  { %4054 = dma.done.wait [#allocation3], 256  }
  0x34   :  { %4055 = vsyncadd [#allocation3], 4294967040 }
  0x35   :  { %4056 = dma.done.wait [#allocation6], 1024  }
  0x36   :  { %4057 = vsyncadd [#allocation6], 4294966272  ;;  %vm75_vm0 = vcmask 261120   ;;  %v64_v0 = vld [vmem:[#allocation5] sm:$0xff]  ;;  %v65_v1 = vld [vmem:[#allocation5 + $0x8] sm:$0xff]  ;;  %s4065_s7 = smov 104   ;;  %v182_v22 = vlaneseq }
  0x37   :  { %v66_v2 = vld [vmem:[#allocation5 + $0x10] sm:$0xff]  ;;  %v3869_v3 = vpack.c.bf16 %v65_v1, %v64_v0  ;;  %v67_v4 = vld [vmem:[#allocation5 + $0x18] sm:$0xff]  ;;  %s4066_s8 = smov 120   ;;  %v4067_v12 = vmov 0.0   ;;  %s4068_s9 = smov 112   ;;  %vm4070_vm1 = vmmov 0  }
  0x38   :  { %v62_v5 = vld [vmem:[#allocation2] sm:$0xff]  ;;  %v3873_v6 = vpack.c.bf16 %v67_v4, %v66_v2  ;;  %v63_v7 = vld [vmem:[#allocation2 + $0x8] sm:$0xff]  ;;  %3698 = vmatprep.subr.mxu1 %v4067_v12  ;;  %3700 = vmatprep.mubr.msk.f32.mxu1 %vm4070_vm1, %v4067_v12  ;;  %s4071_s10 = smov 64   ;;  %v4072_v20 = vmov 1983009808   ;;  %v183_v24 = vshrl.u32 %v182_v22, 7 }
  0x39   :  { %3695 = vmatprep.mubr.msk.f32.mxu0 %vm75_vm0, %v62_v5  ;;  %3870 = vmatprep.subr.bf16.mxu0 %v3869_v3  ;;  %v3541_v8 = vld [vmem:[%s4708_s2] ss:$0 sm:$0xff]  ;;  %s4069_s2 = smov 96   ;;  %v180_v21 = vunpack.c.l.s4 %v4072_v20  ;;  %v4073_v25 = vmov 1934713408   ;;  %vm633_vm2 = vcmask 64512  }
  0x3a   :  { %3872 = vmatpush3.bf16.msra.mxu0 %v3869_v3  ;;  %v212_v26 = vunpack.c.l.s4 %v4073_v25  ;;  %vm1866_vm3 = vcmask 27648   ;;  %vm2047_vm4 = vcmask 1043456   ;;  %vm2043_vm5 = vcmask 31744   ;;  %s4074_s11 = smov 16   ;;  %s4075_s12 = smov 24  }
  0x3b   :  { %3874 = vmatprep.subr.bf16.mxu0 %v3873_v6  ;;  %v181_v23 = vunpack.c.0.s8 %v180_v21  ;;  %vm3423_vm6 = vcmask 130048   ;;  %vm3426_vm7 = vcmask 195584   ;;  %s4076_s15 = smov [#allocation8]  }
  0x3c   :  { %v213_v34 = vunpack.c.0.s8 %v212_v26  ;;  %s3528_s16 = sshll.u32 %s4076_s15, 4  ;;  %s3529_s16 = int_to_ptr.vmem [resolvable:$true] %s3528_s16 }
  0x3d   :  { %v4197_v31 = vsub.s32 %v181_v23, %v183_v24  ;;  %s4032_s1 = scalar_lea.vmem %s3529_s16, 256  ;;  %p4037_p11 = scmp.lt.s32.totalorder %s3529_s16, %s3529_s16 }
  0x3e   :  { %3876 = vmatpush3.bf16.msra.mxu0 %v3873_v6  ;;  %v4213_v50 = vsub.s32 %v213_v34, %v183_v24  ;;  %p4033_p10 = scmp.ne.s32.totalorder %s3529_s16, %s4032_s1  ;;  %p4038_p12 = scmp.lt.s32.totalorder %s4032_s1, %s4032_s1 }
  0x3f   :  { %3718 = vmatprep.subr.mxu0 %v4067_v12 }
  0x40   :  { %p4039_p13 = por %p4038_p12, %p4037_p11 }
  0x41   :  { %3696 = vmatmul.mubr.msk.f32.vlgmr.msra.gmra.mrb[0].mxu0 %vm75_vm0, %v63_v7 }
  0x42   :  { %3720 = vmatprep.mubr.msk.f32.mxu0 %vm4070_vm1, %v4067_v12  ;;  %p4040_p0 = pnand %p4039_p13, %p4033_p10 }
 0x114   :  { %v3697_v9 = vpop.f32.mrb[0].mxu0 }
 0x115   :  { %v148_v10 = vpop.f32.mrb[1].mxu0  ;;  %v4166_v13 = vadd.f32 %v3697_v9, %v3541_v8 }
 0x116   :  { %v149_v11 = vadd.f32 %v3541_v8, %v148_v10 }
 0x118   :  { %171 = vrot.lane.b32.xlu1 %v149_v11, %s4065_s7  ;;  %159 = vrot.lane.b32.xlu0 %v149_v11, %s4066_s8 }
 0x11c   :  { %161 = vrot.lane.b32.xlu1 %v4166_v13, %s4066_s8  ;;  %165 = vrot.lane.b32.xlu0 %v149_v11, %s4068_s9 }
 0x120   :  { %173 = vrot.lane.b32.xlu1 %v4166_v13, %s4065_s7  ;;  %167 = vrot.lane.b32.xlu0 %v4166_v13, %s4068_s9 }
 0x124   :  { %313 = vrot.lane.b32.xlu0 %v149_v11, %s4069_s2 }
 0x18a   :  { %v4171_v14 = vpop.permute.xlu1 %171  ;;  %v4173_v15 = vpop.permute.xlu0 %159 }
 0x18b   :  { %317 = vrot.lane.b32.xlu1 %v4173_v15, %s4069_s2  ;;  %v193_v32 = vcombine.low %v4173_v15, %v4171_v14  ;;  %v194_v33 = vcombine.high %v4173_v15, %v4171_v14 }
 0x18d   :  { %v201_v47 = vrot.slane %v193_v32, %v4197_v31  ;;  %v208_v48 = vrot.slane %v194_v33, %v4197_v31 }
 0x18e   :  { %v4180_v16 = vpop.permute.xlu0 %165  ;;  %v4184_v17 = vpop.permute.xlu1 %161 }
 0x18f   :  { %325 = vrot.lane.b32.xlu1 %v4171_v14, %s4069_s2  ;;  %321 = vrot.lane.b32.xlu0 %v4180_v16, %s4069_s2  ;;  %v177_v29 = vcombine.low %v149_v11, %v4180_v16  ;;  %v178_v30 = vcombine.high %v149_v11, %v4180_v16 }
 0x191   :  { %v4204_v41 = vrot.slane %v177_v29, %v4197_v31  ;;  %v192_v42 = vrot.slane %v178_v30, %v4197_v31 }
 0x192   :  { %v4188_v18 = vpop.permute.xlu1 %173  ;;  %v4190_v19 = vpop.permute.xlu0 %167 }
 0x193   :  { %319 = vrot.lane.b32.xlu1 %v4184_v17, %s4069_s2  ;;  %315 = vrot.lane.b32.xlu0 %v4166_v13, %s4069_s2  ;;  %v225_v54 = vcombine.low %v192_v42, %v208_v48  ;;  %v209_v55 = vcombine.low %v4204_v41, %v201_v47  ;;  %v261_v56 = vcombine.low %v4184_v17, %v4188_v18 }
 0x194   :  { %v245_v59 = vcombine.low %v4166_v13, %v4190_v19  ;;  %v226_v0 = vcombine.high %v192_v42, %v208_v48  ;;  %v210_v23 = vcombine.high %v4204_v41, %v201_v47  ;;  %v262_v25 = vcombine.high %v4184_v17, %v4188_v18 }
 0x195   :  { %v4226_v1 = vrot.slane %v225_v54, %v4213_v50  ;;  %v217_v3 = vrot.slane %v209_v55, %v4213_v50  ;;  %v269_v4 = vrot.slane %v261_v56, %v4197_v31  ;;  %v246_v26 = vcombine.high %v4166_v13, %v4190_v19 }
 0x196   :  { %v314_v27 = vpop.permute.xlu0 %313  ;;  %v253_v7 = vrot.slane %v245_v59, %v4197_v31  ;;  %v4250_v24 = vrot.slane %v226_v0, %v4213_v50  ;;  %v224_v34 = vrot.slane %v210_v23, %v4213_v50 }
 0x197   :  { %327 = vrot.lane.b32.xlu1 %v4188_v18, %s4069_s2  ;;  %323 = vrot.lane.b32.xlu0 %v4190_v19, %s4069_s2  ;;  %v241_v22 = vcombine.high %v217_v3, %v4067_v12 }
 0x198   :  { %v244_v55 = vcombine.high %v4250_v24, %v4067_v12 }
 0x19b   :  { %473 = vrot.lane.b32.xlu1 %v149_v11, %s4071_s10 }
 0x1fd   :  { %v318_v28 = vpop.permute.xlu1 %317 }
 0x201   :  { %v326_v35 = vpop.permute.xlu1 %325  ;;  %v322_v36 = vpop.permute.xlu0 %321 }
 0x202   :  { %v353_v37 = vcombine.low %v318_v28, %v326_v35  ;;  %v354_v38 = vcombine.high %v318_v28, %v326_v35  ;;  %v337_v39 = vcombine.low %v314_v27, %v322_v36  ;;  %v338_v40 = vcombine.high %v314_v27, %v322_v36 }
 0x203   :  { %v277_v27 = vcombine.low %v253_v7, %v269_v4  ;;  %v276_v35 = vrot.slane %v262_v25, %v4197_v31  ;;  %v260_v36 = vrot.slane %v246_v26, %v4197_v31 }
 0x204   :  { %v361_v43 = vrot.slane %v353_v37, %v4197_v31  ;;  %v368_v44 = vrot.slane %v354_v38, %v4197_v31  ;;  %v345_v45 = vrot.slane %v337_v39, %v4197_v31  ;;  %v352_v46 = vrot.slane %v338_v40, %v4197_v31 }
 0x205   :  { %v320_v49 = vpop.permute.xlu1 %319  ;;  %v316_v53 = vpop.permute.xlu0 %315  ;;  %v278_v37 = vcombine.high %v253_v7, %v269_v4  ;;  %v285_v38 = vrot.slane %v277_v27, %v4213_v50  ;;  %v294_v48 = vcombine.high %v260_v36, %v276_v35 }
 0x206   :  { %v369_v51 = vcombine.low %v345_v45, %v361_v43  ;;  %v385_v52 = vcombine.low %v352_v46, %v368_v44  ;;  %v386_v60 = vcombine.high %v352_v46, %v368_v44  ;;  %v370_v8 = vcombine.high %v345_v45, %v361_v43 }
 0x207   :  { %v292_v42 = vrot.slane %v278_v37, %v4213_v50  ;;  %v293_v43 = vcombine.low %v260_v36, %v276_v35  ;;  %v242_v44 = vcombine.high %v224_v34, %v4067_v12  ;;  %v308_v54 = vrot.slane %v294_v48, %v4213_v50 }
 0x208   :  { %v4219_v57 = vrot.slane %v385_v52, %v4213_v50  ;;  %v377_v58 = vrot.slane %v369_v51, %v4213_v50  ;;  %v4238_v9 = vrot.slane %v386_v60, %v4213_v50  ;;  %v384_v28 = vrot.slane %v370_v8, %v4213_v50 }
 0x209   :  { %v328_v61 = vpop.permute.xlu1 %327  ;;  %v324_v63 = vpop.permute.xlu0 %323  ;;  %v243_v51 = vcombine.high %v4226_v1, %v4067_v12  ;;  %v310_v59 = vcombine.high %v292_v42, %v4067_v12 }
 0x20a   :  { %v421_v62 = vcombine.low %v320_v49, %v328_v61  ;;  %3699 = vmatpush3.xpose.msk.msra.mxu1 %vm633_vm2, %v377_v58  ;;  %v405_v2 = vcombine.low %v316_v53, %v324_v63  ;;  %3719 = vmatpush3.xpose.msk.msra.mxu0 %vm633_vm2, %v4219_v57  ;;  %v401_v6 = vcombine.high %v377_v58, %v4067_v12 }
 0x20b   :  { %3703 = vmatprep.subr.mxu1 %v4067_v12  ;;  %3728 = vmatprep.subr.mxu0 %v4067_v12  ;;  %v422_v11 = vcombine.high %v320_v49, %v328_v61  ;;  %v406_v20 = vcombine.high %v316_v53, %v324_v63  ;;  %v402_v39 = vcombine.high %v384_v28, %v4067_v12 }
 0x20c   :  { %v429_v5 = vrot.slane %v421_v62, %v4197_v31  ;;  %v413_v10 = vrot.slane %v405_v2, %v4197_v31  ;;  %v403_v45 = vcombine.high %v4219_v57, %v4067_v12  ;;  %v301_v49 = vrot.slane %v293_v43, %v4213_v50 }
 0x20d   :  { %3701 = vmatmul.mubr.msk.f32.vlgmr.msra.gmra.mrb[0].mxu1 %vm633_vm2, %v217_v3  ;;  %3721 = vmatmul.mubr.msk.f32.vlgmr.msra.gmra.mrb[2].mxu0 %vm633_vm2, %v4226_v1  ;;  %v436_v30 = vrot.slane %v422_v11, %v4197_v31  ;;  %v420_v32 = vrot.slane %v406_v20, %v4197_v31  ;;  %v404_v52 = vcombine.high %v4238_v9, %v4067_v12 }
 0x20e   :  { %3704 = vmatpush3.xpose.msk.msra.mxu1 %vm633_vm2, %v401_v6  ;;  %v437_v21 = vcombine.low %v413_v10, %v429_v5  ;;  %3729 = vmatpush3.xpose.msk.msra.mxu0 %vm633_vm2, %v4238_v9  ;;  %v438_v33 = vcombine.high %v413_v10, %v429_v5  ;;  %v309_v57 = vcombine.high %v285_v38, %v4067_v12 }
 0x20f   :  { %3705 = vmatprep.mubr.msk.f32.mxu1 %vm4070_vm1, %v4067_v12  ;;  %3730 = vmatprep.mubr.msk.f32.mxu0 %vm4070_vm1, %v4067_v12  ;;  %v453_v41 = vcombine.low %v420_v32, %v436_v30  ;;  %v454_v46 = vcombine.high %v420_v32, %v436_v30  ;;  %v311_v61 = vcombine.high %v301_v49, %v4067_v12 }
 0x210   :  { %v445_v29 = vrot.slane %v437_v21, %v4213_v50  ;;  %3708 = vmatprep.subr.mxu1 %v4067_v12  ;;  %3738 = vmatprep.subr.mxu0 %v4067_v12  ;;  %v452_v40 = vrot.slane %v438_v33, %v4213_v50  ;;  %v312_v63 = vcombine.high %v308_v54, %v4067_v12 }
 0x211   :  { %3706 = vmatmul.mubr.msk.f32.vlgmr.msra.gmra.mrb[2].mxu1 %vm633_vm2, %v241_v22  ;;  %3731 = vmatmul.mubr.msk.f32.vlgmr.msra.gmra.mrb[4].mxu0 %vm633_vm2, %v4250_v24  ;;  %v461_v47 = vrot.slane %v453_v41, %v4213_v50  ;;  %v468_v53 = vrot.slane %v454_v46, %v4213_v50 }
 0x212   :  { %3709 = vmatpush3.xpose.msk.msra.mxu1 %vm633_vm2, %v384_v28  ;;  %3739 = vmatpush3.xpose.msk.msra.mxu0 %vm633_vm2, %v445_v29  ;;  %v469_v56 = vcombine.high %v445_v29, %v4067_v12  ;;  %v470_v58 = vcombine.high %v452_v40, %v4067_v12 }
 0x213   :  { %3710 = vmatprep.mubr.msk.f32.mxu1 %vm4070_vm1, %v4067_v12  ;;  %3740 = vmatprep.mubr.msk.f32.mxu0 %vm4070_vm1, %v4067_v12  ;;  %v471_v60 = vcombine.high %v461_v47, %v4067_v12  ;;  %v472_v62 = vcombine.high %v468_v53, %v4067_v12 }
 0x214   :  { %3713 = vmatprep.subr.mxu1 %v4067_v12  ;;  %3748 = vmatprep.subr.mxu0 %v4067_v12 }
 0x215   :  { %3711 = vmatmul.mubr.msk.f32.vlgmr.msra.gmra.mrb[4].mxu1 %vm633_vm2, %v224_v34  ;;  %3741 = vmatmul.mubr.msk.f32.vlgmr.msra.gmra.mrb[6].mxu0 %vm633_vm2, %v285_v38 }
 0x216   :  { %3714 = vmatpush3.xpose.msk.msra.mxu1 %vm633_vm2, %v402_v39  ;;  %3749 = vmatpush3.xpose.msk.msra.mxu0 %vm633_vm2, %v452_v40 }
 0x217   :  { %3715 = vmatprep.mubr.msk.f32.mxu1 %vm4070_vm1, %v4067_v12  ;;  %3750 = vmatprep.mubr.msk.f32.mxu0 %vm4070_vm1, %v4067_v12 }
 0x218   :  { %3723 = vmatprep.subr.mxu1 %v4067_v12  ;;  %3758 = vmatprep.subr.mxu0 %v4067_v12 }
 0x219   :  { %3716 = vmatmul.mubr.msk.f32.vlgmr.msra.gmra.mrb[6].mxu1 %vm633_vm2, %v242_v44  ;;  %3751 = vmatmul.mubr.msk.f32.vlgmr.msra.gmra.mrb[8].mxu0 %vm633_vm2, %v292_v42 }
 0x21a   :  { %3724 = vmatpush3.xpose.msk.msra.mxu1 %vm633_vm2, %v403_v45  ;;  %3759 = vmatpush3.xpose.msk.msra.mxu0 %vm633_vm2, %v461_v47 }
 0x21b   :  { %3725 = vmatprep.mubr.msk.f32.mxu1 %vm4070_vm1, %v4067_v12  ;;  %3760 = vmatprep.mubr.msk.f32.mxu0 %vm4070_vm1, %v4067_v12 }
 0x21c   :  { %3733 = vmatprep.subr.mxu1 %v4067_v12  ;;  %3768 = vmatprep.subr.mxu0 %v4067_v12 }
 0x21d   :  { %3726 = vmatmul.mubr.msk.f32.vlgmr.msra.gmra.mrb[8].mxu1 %vm633_vm2, %v243_v51  ;;  %3761 = vmatmul.mubr.msk.f32.vlgmr.msra.gmra.mrb[10].mxu0 %vm633_vm2, %v301_v49 }
 0x21e   :  { %3734 = vmatpush3.xpose.msk.msra.mxu1 %vm633_vm2, %v404_v52  ;;  %3769 = vmatpush3.xpose.msk.msra.mxu0 %vm633_vm2, %v468_v53 }
 0x21f   :  { %3735 = vmatprep.mubr.msk.f32.mxu1 %vm4070_vm1, %v4067_v12  ;;  %3770 = vmatprep.mubr.msk.f32.mxu0 %vm4070_vm1, %v4067_v12 }
 0x220   :  { %3743 = vmatprep.subr.mxu1 %v4067_v12  ;;  %3778 = vmatprep.subr.mxu0 %v4067_v12 }
 0x221   :  { %3736 = vmatmul.mubr.msk.f32.vlgmr.msra.gmra.mrb[10].mxu1 %vm633_vm2, %v244_v55  ;;  %3771 = vmatmul.mubr.msk.f32.vlgmr.msra.gmra.mrb[12].mxu0 %vm633_vm2, %v308_v54 }
 0x222   :  { %3744 = vmatpush3.xpose.msk.msra.mxu1 %vm633_vm2, %v469_v56  ;;  %3745 = vmatprep.mubr.msk.f32.mxu1 %vm4070_vm1, %v4067_v12 }
 0x223   :  { %3753 = vmatprep.subr.mxu1 %v4067_v12  ;;  %3780 = vmatprep.mubr.msk.f32.mxu0 %vm4070_vm1, %v4067_v12 }
 0x225   :  { %3746 = vmatmul.mubr.msk.f32.vlgmr.msra.gmra.mrb[12].mxu1 %vm633_vm2, %v309_v57 }
 0x226   :  { %3754 = vmatpush3.xpose.msk.msra.mxu1 %vm633_vm2, %v470_v58  ;;  %3755 = vmatprep.mubr.msk.f32.mxu1 %vm4070_vm1, %v4067_v12 }
 0x227   :  { %3763 = vmatprep.subr.mxu1 %v4067_v12 }
 0x229   :  { %3756 = vmatmul.mubr.msk.f32.vlgmr.msra.gmra.mrb[14].mxu1 %vm633_vm2, %v310_v59 }
 0x22a   :  { %3764 = vmatpush3.xpose.msk.msra.mxu1 %vm633_vm2, %v471_v60  ;;  %3765 = vmatprep.mubr.msk.f32.mxu1 %vm4070_vm1, %v4067_v12 }
 0x22b   :  { %3773 = vmatprep.subr.mxu1 %v4067_v12 }
 0x22d   :  { %3766 = vmatmul.mubr.msk.f32.vlgmr.msra.gmra.mrb[16].mxu1 %vm633_vm2, %v311_v61 }
 0x22e   :  { %3774 = vmatpush3.xpose.msk.msra.mxu1 %vm633_vm2, %v472_v62  ;;  %3775 = vmatprep.mubr.msk.f32.mxu1 %vm4070_vm1, %v4067_v12 }
 0x22f   :  { %3783 = vmatprep.subr.mxu1 %v4067_v12 }
 0x231   :  { %3776 = vmatmul.mubr.msk.f32.vlgmr.msra.gmra.mrb[18].mxu1 %vm633_vm2, %v312_v63 }
 0x232   :  { %3785 = vmatprep.mubr.msk.f32.mxu1 %vm4070_vm1, %v4067_v12 }
 0x2e0   :  { %v706_v0 = vpop.f32.mrb[0].mxu1  ;;  %v1010_v2 = vpop.f32.mrb[2].mxu0 }
 0x2e1   :  { %v4361_v1 = vmul.f32 0.35355338, %v706_v0  ;;  %v3702_v3 = vpop.f32.mrb[1].mxu1  ;;  %v4363_v4 = vmul.f32 0.35355338, %v1010_v2  ;;  %v3722_v5 = vpop.f32.mrb[3].mxu0 }
 0x2e3   :  { %v1867_v6 = vsel %vm1866_vm3, %v4361_v1, -inf  ;;  %v1879_v7 = vsel %vm1866_vm3, %v4363_v4, -inf }
 0x2e4   :  { %1868 = vmax.xlane.f32.xlu0 %v1867_v6  ;;  %v782_v8 = vpop.f32.mrb[2].mxu1  ;;  %1880 = vmax.xlane.f32.xlu1 %v1879_v7  ;;  %v1162_v9 = vpop.f32.mrb[4].mxu0 }
 0x2e5   :  { %v4369_v10 = vmul.f32 0.35355338, %v782_v8  ;;  %v3707_v11 = vpop.f32.mrb[3].mxu1  ;;  %v3732_v20 = vpop.f32.mrb[5].mxu0  ;;  %v4373_v22 = vmul.f32 0.35355338, %v1162_v9 }
 0x2e7   :  { %v1870_v21 = vsel %vm1866_vm3, %v4369_v10, -inf  ;;  %v1885_v29 = vsel %vm1866_vm3, %v4373_v22, -inf }
 0x2e8   :  { %1871 = vmax.xlane.f32.xlu1 %v1870_v21  ;;  %v858_v23 = vpop.f32.mrb[4].mxu1  ;;  %v1314_v24 = vpop.f32.mrb[6].mxu0 }
 0x2e9   :  { %v4375_v25 = vmul.f32 0.35355338, %v858_v23  ;;  %v3712_v26 = vpop.f32.mrb[5].mxu1  ;;  %v3742_v27 = vpop.f32.mrb[7].mxu0  ;;  %v4377_v28 = vmul.f32 0.35355338, %v1314_v24 }
 0x2ea   :  { %v4433_v21 = vpop.permute.xlu1 %473 }
 0x2eb   :  { %v1873_v30 = vsel %vm1866_vm3, %v4375_v25, -inf  ;;  %v1891_v38 = vsel %vm1866_vm3, %v4377_v28, -inf }
 0x2ec   :  { %1886 = vmax.xlane.f32.xlu1 %v1885_v29  ;;  %1874 = vmax.xlane.f32.xlu0 %v1873_v30  ;;  %v934_v32 = vpop.f32.mrb[6].mxu1  ;;  %v1466_v33 = vpop.f32.mrb[8].mxu0 }
 0x2ed   :  { %v4383_v34 = vmul.f32 0.35355338, %v934_v32  ;;  %v3717_v35 = vpop.f32.mrb[7].mxu1  ;;  %v3752_v36 = vpop.f32.mrb[9].mxu0  ;;  %v4385_v37 = vmul.f32 0.35355338, %v1466_v33 }
 0x2ef   :  { %v1876_v39 = vsel %vm1866_vm3, %v4383_v34, -inf  ;;  %v1897_v46 = vsel %vm1866_vm3, %v4385_v37, -inf }
 0x2f0   :  { %1892 = vmax.xlane.f32.xlu1 %v1891_v38  ;;  %1877 = vmax.xlane.f32.xlu0 %v1876_v39  ;;  %v1086_v40 = vpop.f32.mrb[8].mxu1  ;;  %v1618_v41 = vpop.f32.mrb[10].mxu0 }
 0x2f1   :  { %v4391_v42 = vmul.f32 0.35355338, %v1086_v40  ;;  %v3727_v43 = vpop.f32.mrb[9].mxu1  ;;  %v3762_v44 = vpop.f32.mrb[11].mxu0  ;;  %v4393_v45 = vmul.f32 0.35355338, %v1618_v41 }
 0x2f3   :  { %v1882_v47 = vsel %vm1866_vm3, %v4391_v42, -inf  ;;  %v1903_v55 = vsel %vm1866_vm3, %v4393_v45, -inf }
 0x2f4   :  { %1898 = vmax.xlane.f32.xlu1 %v1897_v46  ;;  %1883 = vmax.xlane.f32.xlu0 %v1882_v47  ;;  %v1238_v48 = vpop.f32.mrb[10].mxu1  ;;  %v1770_v49 = vpop.f32.mrb[12].mxu0 }
 0x2f5   :  { %v4399_v51 = vmul.f32 0.35355338, %v1238_v48  ;;  %v3737_v52 = vpop.f32.mrb[11].mxu1  ;;  %v3772_v53 = vpop.f32.mrb[13].mxu0  ;;  %v4401_v54 = vmul.f32 0.35355338, %v1770_v49 }
 0x2f7   :  { %v1888_v56 = vsel %vm1866_vm3, %v4399_v51, -inf  ;;  %v1909_v60 = vsel %vm1866_vm3, %v4401_v54, -inf }
 0x2f8   :  { %1904 = vmax.xlane.f32.xlu1 %v1903_v55  ;;  %1889 = vmax.xlane.f32.xlu0 %v1888_v56  ;;  %v1390_v57 = vpop.f32.mrb[12].mxu1 }
 0x2f9   :  { %v4407_v58 = vmul.f32 0.35355338, %v1390_v57  ;;  %v3747_v59 = vpop.f32.mrb[13].mxu1 }
 0x2fb   :  { %v1894_v61 = vsel %vm1866_vm3, %v4407_v58, -inf }
 0x2fc   :  { %1910 = vmax.xlane.f32.xlu1 %v1909_v60  ;;  %1895 = vmax.xlane.f32.xlu0 %v1894_v61  ;;  %v1542_v62 = vpop.f32.mrb[14].mxu1 }
 0x2fd   :  { %v4413_v63 = vmul.f32 0.35355338, %v1542_v62  ;;  %v3757_v0 = vpop.f32.mrb[15].mxu1 }
 0x2ff   :  { %v1900_v2 = vsel %vm1866_vm3, %v4413_v63, -inf }
 0x300   :  { %1901 = vmax.xlane.f32.xlu0 %v1900_v2  ;;  %v1694_v3 = vpop.f32.mrb[16].mxu1 }
 0x301   :  { %v4417_v5 = vmul.f32 0.35355338, %v1694_v3  ;;  %v3767_v6 = vpop.f32.mrb[17].mxu1 }
 0x303   :  { %v1906_v7 = vsel %vm1866_vm3, %v4417_v5, -inf }
 0x304   :  { %1907 = vmax.xlane.f32.xlu0 %v1906_v7  ;;  %v1846_v8 = vpop.f32.mrb[18].mxu1 }
 0x305   :  { %v4421_v9 = vmul.f32 0.35355338, %v1846_v8  ;;  %v3777_v11 = vpop.f32.mrb[19].mxu1 }
 0x307   :  { %v1912_v20 = vsel %vm1866_vm3, %v4421_v9, -inf }
 0x308   :  { %1913 = vmax.xlane.f32.xlu0 %v1912_v20 }
 0x30d   :  { %481 = vrot.lane.b32.xlu1 %v4180_v16, %s4071_s10 }
 0x311   :  { %485 = vrot.lane.b32.xlu1 %v4171_v14, %s4071_s10 }
 0x315   :  { %475 = vrot.lane.b32.xlu1 %v4166_v13, %s4071_s10 }
 0x31e   :  { %477 = vrot.lane.b32.xlu0 %v4173_v15, %s4071_s10 }
 0x371   :  { %v1869_v23 = vpop.xlane.xlu0 %1868  ;;  %v1881_v24 = vpop.xlane.xlu1 %1880 }
 0x372   :  { %v1915_v26 = vsub.f32 %v4361_v1, %v1869_v23  ;;  %v1919_v27 = vsub.f32 %v4363_v4, %v1881_v24 }
 0x374   :  { %v1931_v29 = vmul.f32 1.442695, %v1915_v26  ;;  %v1939_v30 = vmul.f32 1.442695, %v1919_v27 }
 0x375   :  { %v1872_v16 = vpop.xlane.xlu1 %1871 }
 0x376   :  { %3902 = vpow2.f32 %v1931_v29  ;;  %v1916_v14 = vsub.f32 %v4369_v10, %v1872_v16 }
 0x377   :  { %3904 = vpow2.f32 %v1939_v30 }
 0x378   :  { %v1933_v32 = vmul.f32 1.442695, %v1916_v14 }
 0x379   :  { %v1887_v13 = vpop.xlane.xlu1 %1886  ;;  %v1875_v33 = vpop.xlane.xlu0 %1874 }
 0x37a   :  { %3906 = vpow2.f32 %v1933_v32  ;;  %v1921_v15 = vsub.f32 %v4373_v22, %v1887_v13  ;;  %v1917_v35 = vsub.f32 %v4375_v25, %v1875_v33 }
 0x37c   :  { %v1943_v36 = vmul.f32 1.442695, %v1921_v15  ;;  %v1935_v38 = vmul.f32 1.442695, %v1917_v35 }
 0x37d   :  { %v1893_v1 = vpop.xlane.xlu1 %1892  ;;  %v1878_v39 = vpop.xlane.xlu0 %1877 }
 0x37e   :  { %3908 = vpow2.f32 %v1943_v36  ;;  %v1923_v4 = vsub.f32 %v4377_v28, %v1893_v1  ;;  %v1918_v10 = vsub.f32 %v4383_v34, %v1878_v39 }
 0x37f   :  { %3910 = vpow2.f32 %v1935_v38 }
 0x380   :  { %v4441_v40 = vpop.eup %3902  ;;  %v1947_v41 = vmul.f32 1.442695, %v1923_v4  ;;  %v1937_v44 = vmul.f32 1.442695, %v1918_v10 }
 0x381   :  { %v1963_v43 = vsel %vm1866_vm3, %v4441_v40, 0.0  ;;  %v4446_v22 = vpop.eup %3904  ;;  %v1899_v25 = vpop.xlane.xlu1 %1898 }
 0x382   :  { %1964 = vadd.xlane.f32.xlu1 %v1963_v43  ;;  %3912 = vpow2.f32 %v1947_v41  ;;  %v1925_v46 = vsub.f32 %v4385_v37, %v1899_v25  ;;  %v1884_v47 = vpop.xlane.xlu0 %1883  ;;  %v1975_v49 = vsel %vm1866_vm3, %v4446_v22, 0.0 }
 0x383   :  { %3914 = vpow2.f32 %v1937_v44  ;;  %v1920_v34 = vsub.f32 %v4391_v42, %v1884_v47 }
 0x384   :  { %v4449_v28 = vpop.eup %3906  ;;  %v1951_v48 = vmul.f32 1.442695, %v1925_v46 }
 0x385   :  { %v1905_v52 = vpop.xlane.xlu1 %1904  ;;  %v1966_v53 = vsel %vm1866_vm3, %v4449_v28, 0.0  ;;  %v1941_v59 = vmul.f32 1.442695, %v1920_v34 }
 0x386   :  { %1976 = vadd.xlane.f32.xlu1 %v1975_v49  ;;  %v1927_v55 = vsub.f32 %v4393_v45, %v1905_v52  ;;  %v1890_v56 = vpop.xlane.xlu0 %1889  ;;  %1967 = vadd.xlane.f32.xlu0 %v1966_v53  ;;  %3916 = vpow2.f32 %v1951_v48 }
 0x387   :  { %v1922_v37 = vsub.f32 %v4399_v51, %v1890_v56 }
 0x388   :  { %v4458_v57 = vpop.eup %3908  ;;  %v1955_v60 = vmul.f32 1.442695, %v1927_v55 }
 0x389   :  { %v1911_v42 = vpop.xlane.xlu1 %1910  ;;  %v1981_v61 = vsel %vm1866_vm3, %v4458_v57, 0.0  ;;  %v4462_v62 = vpop.eup %3910  ;;  %v1945_v45 = vmul.f32 1.442695, %v1922_v37 }
 0x38a   :  { %3918 = vpow2.f32 %v1955_v60  ;;  %v1929_v0 = vsub.f32 %v4401_v54, %v1911_v42  ;;  %v1896_v2 = vpop.xlane.xlu0 %1895  ;;  %1982 = vadd.xlane.f32.xlu1 %v1981_v61  ;;  %v1969_v20 = vsel %vm1866_vm3, %v4462_v62, 0.0 }
 0x38b   :  { %v1924_v3 = vsub.f32 %v4407_v58, %v1896_v2  ;;  %3920 = vpow2.f32 %v1941_v59 }
 0x38c   :  { %v4466_v51 = vpop.eup %3912  ;;  %v1959_v6 = vmul.f32 1.442695, %v1929_v0 }
 0x38d   :  { %v1949_v7 = vmul.f32 1.442695, %v1924_v3  ;;  %v482_v8 = vpop.permute.xlu1 %481  ;;  %v1987_v11 = vsel %vm1866_vm3, %v4466_v51, 0.0  ;;  %v4472_v23 = vpop.eup %3914 }
 0x38e   :  { %3922 = vpow2.f32 %v1959_v6  ;;  %v498_v54 = vcombine.high %v4433_v21, %v482_v8  ;;  %v1902_v24 = vpop.xlane.xlu0 %1901  ;;  %1988 = vadd.xlane.f32.xlu0 %v1987_v11  ;;  %1970 = vadd.xlane.f32.xlu1 %v1969_v20  ;;  %v1972_v27 = vsel %vm1866_vm3, %v4472_v23, 0.0 }
 0x38f   :  { %3924 = vpow2.f32 %v1945_v45  ;;  %v1926_v58 = vsub.f32 %v4413_v63, %v1902_v24 }
 0x390   :  { %3926 = vpow2.f32 %v1949_v7  ;;  %v4478_v29 = vpop.eup %3916  ;;  %v4503_v25 = vrot.slane %v498_v54, %v4197_v31 }
 0x391   :  { %v1953_v26 = vmul.f32 1.442695, %v1926_v58  ;;  %v1993_v63 = vsel %vm1866_vm3, %v4478_v29, 0.0  ;;  %v486_v41 = vpop.permute.xlu1 %485 }
 0x392   :  { %v1908_v30 = vpop.xlane.xlu0 %1907  ;;  %1973 = vadd.xlane.f32.xlu0 %v1972_v27 }
 0x393   :  { %v1928_v16 = vsub.f32 %v4417_v5, %v1908_v30  ;;  %3928 = vpow2.f32 %v1953_v26  ;;  %v497_v5 = vcombine.low %v4433_v21, %v482_v8 }
 0x394   :  { %v4481_v14 = vpop.eup %3918 }
 0x395   :  { %v1957_v32 = vmul.f32 1.442695, %v1928_v16  ;;  %v1999_v13 = vsel %vm1866_vm3, %v4481_v14, 0.0  ;;  %v4487_v15 = vpop.eup %3920  ;;  %v505_v21 = vrot.slane %v497_v5, %v4197_v31  ;;  %v4541_v45 = vpop.permute.xlu1 %475 }
 0x396   :  { %v1914_v33 = vpop.xlane.xlu0 %1913  ;;  %2000 = vadd.xlane.f32.xlu1 %v1999_v13  ;;  %1994 = vadd.xlane.f32.xlu0 %v1993_v63  ;;  %v1978_v39 = vsel %vm1866_vm3, %v4487_v15, 0.0 }
 0x397   :  { %v1930_v35 = vsub.f32 %v4421_v9, %v1914_v33  ;;  %3930 = vpow2.f32 %v1957_v32 }
 0x398   :  { %v4490_v36 = vpop.eup %3922 }
 0x399   :  { %v4493_v38 = vpop.eup %3924  ;;  %v1961_v1 = vmul.f32 1.442695, %v1930_v35  ;;  %v2005_v4 = vsel %vm1866_vm3, %v4490_v36, 0.0 }
 0x39a   :  { %v4499_v10 = vpop.eup %3926  ;;  %v478_v43 = vpop.permute.xlu0 %477  ;;  %2006 = vadd.xlane.f32.xlu1 %v2005_v4  ;;  %1979 = vadd.xlane.f32.xlu0 %v1978_v39  ;;  %v1984_v48 = vsel %vm1866_vm3, %v4493_v38, 0.0 }
 0x39b   :  { %v513_v9 = vcombine.low %v478_v43, %v486_v41  ;;  %v514_v44 = vcombine.high %v478_v43, %v486_v41  ;;  %3932 = vpow2.f32 %v1961_v1  ;;  %v1990_v34 = vsel %vm1866_vm3, %v4499_v10, 0.0 }
 0x39d   :  { %v521_v46 = vrot.slane %v513_v9, %v4197_v31  ;;  %v4507_v47 = vrot.slane %v514_v44, %v4197_v31  ;;  %v4513_v49 = vpop.eup %3928 }
 0x39e   :  { %1985 = vadd.xlane.f32.xlu0 %v1984_v48  ;;  %1991 = vadd.xlane.f32.xlu1 %v1990_v34  ;;  %v1996_v59 = vsel %vm1866_vm3, %v4513_v49, 0.0 }
 0x39f   :  { %v529_v52 = vcombine.low %v505_v21, %v521_v46  ;;  %v530_v53 = vcombine.high %v505_v21, %v521_v46  ;;  %v545_v55 = vcombine.low %v4503_v25, %v4507_v47  ;;  %v546_v56 = vcombine.high %v4503_v25, %v4507_v47 }
 0x3a1   :  { %v537_v37 = vrot.slane %v529_v52, %v4213_v50  ;;  %v4522_v60 = vpop.eup %3930  ;;  %v553_v13 = vrot.slane %v545_v55, %v4213_v50  ;;  %v560_v4 = vrot.slane %v546_v56, %v4213_v50 }
 0x3a2   :  { %1997 = vadd.xlane.f32.xlu0 %v1996_v59  ;;  %v2002_v61 = vsel %vm1866_vm3, %v4522_v60, 0.0 }
 0x3a3   :  { %v561_v42 = vcombine.high %v537_v37, %v4067_v12  ;;  %3779 = vmatpush3.msk.msra.mxu0 %vm2047_vm4, %v537_v37  ;;  %v563_v39 = vcombine.high %v553_v13, %v4067_v12  ;;  %v564_v44 = vcombine.high %v560_v4, %v4067_v12 }
 0x3a4   :  { %3788 = vmatprep.subr.mxu0 %v4067_v12 }
 0x3a5   :  { %3784 = vmatpush3.msk.msra.mxu1 %vm2047_vm4, %v561_v42  ;;  %v4530_v0 = vpop.eup %3932 }
 0x3a6   :  { %2003 = vadd.xlane.f32.xlu0 %v2002_v61  ;;  %3793 = vmatprep.subr.mxu1 %v4067_v12  ;;  %v2008_v2 = vsel %vm1866_vm3, %v4530_v0, 0.0 }
 0x3aa   :  { %2009 = vadd.xlane.f32.xlu0 %v2008_v2 }
 0x3af   :  { %483 = vrot.lane.b32.xlu1 %v4190_v19, %s4071_s10  ;;  %v544_v19 = vrot.slane %v530_v53, %v4213_v50 }
 0x3b3   :  { %487 = vrot.lane.b32.xlu1 %v4188_v18, %s4071_s10 }
 0x3c0   :  { %479 = vrot.lane.b32.xlu0 %v4184_v17, %s4071_s10 }
 0x40f   :  { %v1965_v3 = vpop.xlane.xlu1 %1964 }
 0x410   :  { %3934 = vrcp.f32 %v1965_v3 }
 0x413   :  { %v1977_v6 = vpop.xlane.xlu1 %1976  ;;  %v1968_v7 = vpop.xlane.xlu0 %1967 }
 0x414   :  { %3936 = vrcp.f32 %v1968_v7 }
 0x417   :  { %v1983_v8 = vpop.xlane.xlu1 %1982 }
 0x41a   :  { %v3935_v11 = vpop.eup %3934 }
 0x41b   :  { %v2012_v20 = vmul.f32 %v3935_v11, %v4441_v40  ;;  %v1971_v54 = vpop.xlane.xlu1 %1970  ;;  %v1989_v24 = vpop.xlane.xlu0 %1988  ;;  %v562_v40 = vcombine.high %v544_v19, %v4067_v12 }
 0x41c   :  { %3938 = vrcp.f32 %v1971_v54 }
 0x41d   :  { %3781 = vmatmul.mubr.msk.f32.vlgmr.msra.gmra.mrb[14].mxu0 %vm2043_vm5, %v2012_v20  ;;  %3940 = vrcp.f32 %v1977_v6 }
 0x41e   :  { %3789 = vmatpush3.msk.msra.mxu0 %vm2047_vm4, %v544_v19  ;;  %3790 = vmatprep.mubr.msk.f32.mxu0 %vm4070_vm1, %v4067_v12  ;;  %v3937_v17 = vpop.eup %3936 }
 0x41f   :  { %3798 = vmatprep.subr.mxu0 %v4067_v12  ;;  %v2014_v18 = vmul.f32 %v3937_v17, %v4449_v28  ;;  %v1974_v58 = vpop.xlane.xlu0 %1973 }
 0x420   :  { %3942 = vrcp.f32 %v1974_v58 }
 0x421   :  { %3786 = vmatmul.mubr.msk.f32.vlgmr.msra.gmra.mrb[20].mxu1 %vm2043_vm5, %v2014_v18  ;;  %3944 = vrcp.f32 %v1983_v8 }
 0x422   :  { %3794 = vmatpush3.msk.msra.mxu1 %vm2047_vm4, %v562_v40  ;;  %3795 = vmatprep.mubr.msk.f32.mxu1 %vm4070_vm1, %v4067_v12 }
 0x423   :  { %v2001_v26 = vpop.xlane.xlu1 %2000  ;;  %v1995_v27 = vpop.xlane.xlu0 %1994  ;;  %3803 = vmatprep.subr.mxu1 %v4067_v12 }
 0x426   :  { %v3939_v30 = vpop.eup %3938 }
 0x427   :  { %v2016_v16 = vmul.f32 %v3939_v30, %v4462_v62  ;;  %v1980_v28 = vpop.xlane.xlu0 %1979  ;;  %v3941_v32 = vpop.eup %3940 }
 0x428   :  { %v2007_v63 = vpop.xlane.xlu1 %2006  ;;  %3946 = vrcp.f32 %v1980_v28  ;;  %v2020_v35 = vmul.f32 %v3941_v32, %v4446_v22 }
 0x429   :  { %3791 = vmatmul.mubr.msk.f32.vlgmr.msra.gmra.mrb[16].mxu0 %vm2043_vm5, %v2016_v16 }
 0x42a   :  { %v3943_v33 = vpop.eup %3942  ;;  %3799 = vmatpush3.msk.msra.mxu0 %vm2047_vm4, %v553_v13  ;;  %3800 = vmatprep.mubr.msk.f32.mxu0 %vm4070_vm1, %v4067_v12 }
 0x42b   :  { %v2018_v5 = vmul.f32 %v3943_v33, %v4472_v23  ;;  %v1986_v1 = vpop.xlane.xlu0 %1985  ;;  %3808 = vmatprep.subr.mxu0 %v4067_v12  ;;  %v3945_v62 = vpop.eup %3944 }
 0x42c   :  { %3948 = vrcp.f32 %v1986_v1  ;;  %v2024_v22 = vmul.f32 %v3945_v62, %v4458_v57  ;;  %v1992_v23 = vpop.xlane.xlu1 %1991 }
 0x42d   :  { %3796 = vmatmul.mubr.msk.f32.vlgmr.msra.gmra.mrb[22].mxu1 %vm2043_vm5, %v2018_v5  ;;  %3801 = vmatmul.mubr.msk.f32.vlgmr.msra.gmra.mrb[18].mxu0 %vm2043_vm5, %v2020_v35  ;;  %3950 = vrcp.f32 %v1989_v24 }
 0x42e   :  { %3804 = vmatpush3.msk.msra.mxu1 %vm2047_vm4, %v563_v39  ;;  %3809 = vmatpush3.msk.msra.mxu0 %vm2047_vm4, %v560_v4  ;;  %3952 = vrcp.f32 %v1992_v23 }
 0x42f   :  { %v1998_v41 = vpop.xlane.xlu0 %1997  ;;  %3810 = vmatprep.mubr.msk.f32.mxu0 %vm4070_vm1, %v4067_v12  ;;  %3805 = vmatprep.mubr.msk.f32.mxu1 %vm4070_vm1, %v4067_v12  ;;  %3954 = vrcp.f32 %v1995_v27 }
 0x430   :  { %3813 = vmatprep.subr.mxu1 %v4067_v12  ;;  %3818 = vmatprep.subr.mxu0 %v4067_v12  ;;  %v484_v21 = vpop.permute.xlu1 %483  ;;  %3956 = vrcp.f32 %v1998_v41 }
 0x431   :  { %3811 = vmatmul.mubr.msk.f32.vlgmr.msra.gmra.mrb[20].mxu0 %vm2043_vm5, %v2024_v22  ;;  %v566_v52 = vcombine.high %v4541_v45, %v484_v21  ;;  %3958 = vrcp.f32 %v2001_v26 }
 0x432   :  { %3820 = vmatprep.mubr.msk.f32.mxu0 %vm4070_vm1, %v4067_v12  ;;  %v3947_v43 = vpop.eup %3946 }
 0x433   :  { %v2004_v9 = vpop.xlane.xlu0 %2003  ;;  %v2022_v57 = vmul.f32 %v3947_v43, %v4487_v15  ;;  %v565_v15 = vcombine.low %v4541_v45, %v484_v21  ;;  %v580_v42 = vrot.slane %v566_v52, %v4197_v31 }
 0x434   :  { %v488_v48 = vpop.permute.xlu1 %487  ;;  %3960 = vrcp.f32 %v2004_v9 }
 0x435   :  { %3806 = vmatmul.mubr.msk.f32.vlgmr.msra.gmra.mrb[24].mxu1 %vm2043_vm5, %v2022_v57  ;;  %3962 = vrcp.f32 %v2007_v63 }
 0x436   :  { %v3949_v25 = vpop.eup %3948  ;;  %3814 = vmatpush3.msk.msra.mxu1 %vm2047_vm4, %v564_v44  ;;  %3815 = vmatprep.mubr.msk.f32.mxu1 %vm4070_vm1, %v4067_v12 }
 0x437   :  { %v2010_v46 = vpop.xlane.xlu0 %2009  ;;  %v2026_v47 = vmul.f32 %v3949_v25, %v4493_v38  ;;  %3823 = vmatprep.subr.mxu1 %v4067_v12  ;;  %v573_v38 = vrot.slane %v565_v15, %v4197_v31  ;;  %v3951_v59 = vpop.eup %3950 }
 0x438   :  { %v3953_v3 = vpop.eup %3952  ;;  %v2028_v8 = vmul.f32 %v3951_v59, %v4466_v51  ;;  %3964 = vrcp.f32 %v2010_v46 }
 0x439   :  { %3816 = vmatmul.mubr.msk.f32.vlgmr.msra.gmra.mrb[26].mxu1 %vm2043_vm5, %v2026_v47  ;;  %v3955_v11 = vpop.eup %3954  ;;  %v2030_v19 = vmul.f32 %v3953_v3, %v4499_v10 }
 0x43a   :  { %3825 = vmatprep.mubr.msk.f32.mxu1 %vm4070_vm1, %v4067_v12  ;;  %v3957_v54 = vpop.eup %3956  ;;  %v2032_v51 = vmul.f32 %v3955_v11, %v4478_v29 }
 0x43b   :  { %v480_v34 = vpop.permute.xlu0 %479  ;;  %v3959_v10 = vpop.eup %3958  ;;  %v2034_v58 = vmul.f32 %v3957_v54, %v4513_v49 }
 0x43c   :  { %v581_v53 = vcombine.low %v480_v34, %v488_v48  ;;  %v582_v55 = vcombine.high %v480_v34, %v488_v48  ;;  %v2036_v27 = vmul.f32 %v3959_v10, %v4481_v14 }
 0x43e   :  { %v589_v56 = vrot.slane %v581_v53, %v4197_v31  ;;  %v596_v37 = vrot.slane %v582_v55, %v4197_v31  ;;  %v3961_v40 = vpop.eup %3960 }
 0x43f   :  { %v3963_v49 = vpop.eup %3962  ;;  %v2038_v30 = vmul.f32 %v3961_v40, %v4522_v60 }
 0x440   :  { %v597_v61 = vcombine.low %v573_v38, %v589_v56  ;;  %v598_v2 = vcombine.high %v573_v38, %v589_v56  ;;  %v613_v7 = vcombine.low %v580_v42, %v596_v37  ;;  %v614_v24 = vcombine.high %v580_v42, %v596_v37 }
 0x441   :  { %v2040_v14 = vmul.f32 %v3963_v49, %v4490_v36  ;;  %v3430_v49 = vld [vmem:[#allocation7 + $0x8] sm:$0xff] }
 0x442   :  { %v605_v45 = vrot.slane %v597_v61, %v4213_v50  ;;  %v612_v6 = vrot.slane %v598_v2, %v4213_v50  ;;  %v621_v17 = vrot.slane %v613_v7, %v4213_v50  ;;  %v628_v26 = vrot.slane %v614_v24, %v4213_v50  ;;  %v3965_v16 = vpop.eup %3964 }
 0x443   :  { %v2042_v60 = vmul.f32 %v3965_v16, %v4530_v0 }
 0x444   :  { %v629_v20 = vcombine.high %v605_v45, %v4067_v12  ;;  %3819 = vmatpush3.msk.msra.mxu0 %vm2047_vm4, %v605_v45  ;;  %v630_v18 = vcombine.high %v612_v6, %v4067_v12  ;;  %v631_v29 = vcombine.high %v621_v17, %v4067_v12  ;;  %v632_v28 = vcombine.high %v628_v26, %v4067_v12 }
 0x445   :  { %3821 = vmatmul.mubr.msk.f32.vlgmr.msra.gmra.mrb[22].mxu0 %vm2043_vm5, %v2028_v8  ;;  %3828 = vmatprep.subr.mxu0 %v4067_v12 }
 0x446   :  { %3824 = vmatpush3.msk.msra.mxu1 %vm2047_vm4, %v629_v20  ;;  %3829 = vmatpush3.msk.msra.mxu0 %vm2047_vm4, %v612_v6 }
 0x447   :  { %3826 = vmatmul.mubr.msk.f32.vlgmr.msra.gmra.mrb[28].mxu1 %vm2043_vm5, %v2030_v19  ;;  %3833 = vmatprep.subr.mxu1 %v4067_v12 }
 0x448   :  { %3830 = vmatprep.mubr.msk.f32.mxu0 %vm4070_vm1, %v4067_v12  ;;  %3834 = vmatpush3.msk.msra.mxu1 %vm2047_vm4, %v630_v18 }
 0x449   :  { %3838 = vmatprep.subr.mxu0 %v4067_v12  ;;  %3831 = vmatmul.mubr.msk.f32.vlgmr.msra.gmra.mrb[24].mxu0 %vm2043_vm5, %v2032_v51 }
 0x44a   :  { %3839 = vmatpush3.msk.msra.mxu0 %vm2047_vm4, %v621_v17  ;;  %3835 = vmatprep.mubr.msk.f32.mxu1 %vm4070_vm1, %v4067_v12 }
 0x44b   :  { %3843 = vmatprep.subr.mxu1 %v4067_v12  ;;  %3836 = vmatmul.mubr.msk.f32.vlgmr.msra.gmra.mrb[30].mxu1 %vm2043_vm5, %v2034_v58 }
 0x44c   :  { %3844 = vmatpush3.msk.msra.mxu1 %vm2047_vm4, %v631_v29  ;;  %3840 = vmatprep.mubr.msk.f32.mxu0 %vm4070_vm1, %v4067_v12 }
 0x44d   :  { %3848 = vmatprep.subr.mxu0 %v4067_v12  ;;  %3841 = vmatmul.mubr.msk.f32.vlgmr.msra.gmra.mrb[26].mxu0 %vm2043_vm5, %v2036_v27  ;;  %v3429_v27 = vld [vmem:[#allocation7] sm:$0xff] }
 0x44e   :  { %3849 = vmatpush3.msk.msra.mxu0 %vm2047_vm4, %v628_v26  ;;  %3845 = vmatprep.mubr.msk.f32.mxu1 %vm4070_vm1, %v4067_v12 }
 0x44f   :  { %3853 = vmatprep.subr.mxu1 %v4067_v12  ;;  %3846 = vmatmul.mubr.msk.f32.vlgmr.msra.gmra.mrb[32].mxu1 %vm2043_vm5, %v2038_v30 }
 0x450   :  { %3854 = vmatpush3.msk.msra.mxu1 %vm2047_vm4, %v632_v28  ;;  %3850 = vmatprep.mubr.msk.f32.mxu0 %vm4070_vm1, %v4067_v12  ;;  %v3877_v28 = vpack.c.bf16 %v3430_v49, %v3429_v27 }
 0x451   :  { %3851 = vmatmul.mubr.msk.f32.vlgmr.msra.gmra.mrb[28].mxu0 %vm2043_vm5, %v2040_v14  ;;  %3855 = vmatprep.mubr.msk.f32.mxu1 %vm4070_vm1, %v4067_v12 }
 0x452   :  { %3878 = vmatprep.subr.bf16.mxu0 %v3877_v28 }
 0x453   :  { %3856 = vmatmul.mubr.msk.f32.vlgmr.msra.gmra.mrb[34].mxu1 %vm2043_vm5, %v2042_v60  ;;  %3880 = vmatpush3.bf16.msra.mxu0 %v3877_v28 }
 0x4f0   :  { %v2117_v32 = vpop.f32.mrb[14].mxu0 }
 0x4f1   :  { %v3782_v36 = vpop.f32.mrb[15].mxu0 }
 0x4f2   :  { %v3431_v36 = vld [vmem:[#allocation7 + $0x10] sm:$0xff] }
 0x4f4   :  { %v2193_v13 = vpop.f32.mrb[20].mxu1 }
 0x4f5   :  { %v3787_v63 = vpop.f32.mrb[21].mxu1 }
 0x4fc   :  { %v2269_v33 = vpop.f32.mrb[16].mxu0 }
 0x4fd   :  { %v3261_v35 = vcombine.low %v2117_v32, %v2269_v33  ;;  %v3792_v5 = vpop.f32.mrb[17].mxu0 }
 0x4ff   :  { %v3268_v0 = vrot.slane %v3261_v35, %v4197_v31 }
 0x500   :  { %v2345_v1 = vpop.f32.mrb[22].mxu1  ;;  %v2421_v62 = vpop.f32.mrb[18].mxu0 }
 0x501   :  { %v3269_v4 = vcombine.low %v2193_v13, %v2345_v1  ;;  %v3797_v39 = vpop.f32.mrb[23].mxu1  ;;  %v3802_v22 = vpop.f32.mrb[19].mxu0  ;;  %v3432_v13 = vld [vmem:[#allocation7 + $0x18] sm:$0xff] }
 0x502   :  { %v3881_v35 = vpack.c.bf16 %v3432_v13, %v3431_v36 }
 0x503   :  { %v3276_v23 = vrot.slane %v3269_v4, %v4197_v31 }
 0x504   :  { %v2573_v41 = vpop.f32.mrb[20].mxu0  ;;  %3882 = vmatprep.subr.bf16.mxu0 %v3881_v35 }
 0x505   :  { %v3293_v12 = vcombine.low %v3268_v0, %v3276_v23  ;;  %v3294_v43 = vcombine.high %v3268_v0, %v3276_v23  ;;  %v3277_v9 = vcombine.low %v2421_v62, %v2573_v41  ;;  %v3812_v57 = vpop.f32.mrb[21].mxu0  ;;  %3884 = vmatpush3.bf16.msra.mxu0 %v3881_v35 }
 0x507   :  { %v3284_v15 = vrot.slane %v3277_v9, %v4197_v31  ;;  %v4657_v53 = vrot.slane %v3293_v12, %v4213_v50  ;;  %v3308_v38 = vrot.slane %v3294_v43, %v4213_v50 }
 0x508   :  { %v2497_v44 = vpop.f32.mrb[24].mxu1 }
 0x509   :  { %v3807_v21 = vpop.f32.mrb[25].mxu1 }
 0x50c   :  { %v2649_v25 = vpop.f32.mrb[26].mxu1 }
 0x50d   :  { %v3285_v46 = vcombine.low %v2497_v44, %v2649_v25  ;;  %v3817_v47 = vpop.f32.mrb[27].mxu1 }
 0x50f   :  { %v3292_v48 = vrot.slane %v3285_v46, %v4197_v31 }
 0x511   :  { %v3309_v34 = vcombine.low %v3284_v15, %v3292_v48  ;;  %v3310_v52 = vcombine.high %v3284_v15, %v3292_v48 }
 0x513   :  { %v4660_v55 = vrot.slane %v3309_v34, %v4213_v50  ;;  %v3324_v56 = vrot.slane %v3310_v52, %v4213_v50  ;;  %v3608_v34 = vld [vmem:[%s4710_s4] ss:$0 sm:$0xff] }
 0x515   :  { %v3326_v37 = vcombine.high %v4657_v53, %v4660_v55  ;;  %v3325_v59 = vcombine.low %v4657_v53, %v4660_v55  ;;  %v3327_v42 = vcombine.low %v3308_v38, %v3324_v56  ;;  %v3328_v61 = vcombine.high %v3308_v38, %v3324_v56 }
 0x517   :  { %3399 = vrot.lane.b32.xlu0 %v3326_v37, %s4063_s6 }
 0x518   :  { %v2725_v2 = vpop.f32.mrb[22].mxu0 }
 0x519   :  { %v3822_v3 = vpop.f32.mrb[23].mxu0 }
 0x51a   :  { %v2801_v45 = vpop.f32.mrb[28].mxu1 }
 0x51b   :  { %v3827_v6 = vpop.f32.mrb[29].mxu1  ;;  %3407 = vrot.lane.b32.xlu0 %v3327_v42, %s4074_s11 }
 0x51c   :  { %v2877_v7 = vpop.f32.mrb[24].mxu0 }
 0x51d   :  { %v3329_v8 = vcombine.low %v2725_v2, %v2877_v7  ;;  %v3832_v11 = vpop.f32.mrb[25].mxu0 }
 0x51e   :  { %v2953_v20 = vpop.f32.mrb[30].mxu1 }
 0x51f   :  { %v3337_v19 = vcombine.low %v2801_v45, %v2953_v20  ;;  %v3837_v54 = vpop.f32.mrb[31].mxu1  ;;  %3415 = vrot.lane.b32.xlu0 %v3328_v61, %s4075_s12  ;;  %v3336_v17 = vrot.slane %v3329_v8, %v4197_v31 }
 0x520   :  { %v3029_v24 = vpop.f32.mrb[26].mxu0 }
 0x521   :  { %v3344_v18 = vrot.slane %v3337_v19, %v4197_v31  ;;  %v3842_v51 = vpop.f32.mrb[27].mxu0 }
 0x522   :  { %v3105_v10 = vpop.f32.mrb[32].mxu1 }
 0x523   :  { %v3361_v58 = vcombine.low %v3336_v17, %v3344_v18  ;;  %v3362_v40 = vcombine.high %v3336_v17, %v3344_v18  ;;  %v3847_v26 = vpop.f32.mrb[33].mxu1 }
 0x524   :  { %v3181_v29 = vpop.f32.mrb[28].mxu0 }
 0x525   :  { %v3345_v30 = vcombine.low %v3029_v24, %v3181_v29  ;;  %v3852_v16 = vpop.f32.mrb[29].mxu0  ;;  %v3369_v62 = vrot.slane %v3361_v58, %v4213_v50  ;;  %v3376_v39 = vrot.slane %v3362_v40, %v4213_v50 }
 0x526   :  { %v3257_v14 = vpop.f32.mrb[34].mxu1 }
 0x527   :  { %v3353_v60 = vcombine.low %v3105_v10, %v3257_v14  ;;  %v3857_v32 = vpop.f32.mrb[35].mxu1  ;;  %v3352_v63 = vrot.slane %v3345_v30, %v4197_v31 }
 0x529   :  { %v3360_v33 = vrot.slane %v3353_v60, %v4197_v31 }
 0x52b   :  { %v3377_v5 = vcombine.low %v3352_v63, %v3360_v33  ;;  %v3378_v1 = vcombine.high %v3352_v63, %v3360_v33 }
 0x52d   :  { %v3385_v4 = vrot.slane %v3377_v5, %v4213_v50  ;;  %v3392_v22 = vrot.slane %v3378_v1, %v4213_v50 }
 0x52f   :  { %v3394_v0 = vcombine.high %v3369_v62, %v3385_v4  ;;  %v3393_v23 = vcombine.low %v3369_v62, %v3385_v4  ;;  %v3395_v41 = vcombine.low %v3376_v39, %v3392_v22  ;;  %v3396_v12 = vcombine.high %v3376_v39, %v3392_v22 }
 0x531   :  { %3401 = vrot.lane.b32.xlu1 %v3394_v0, %s4063_s6 }
 0x535   :  { %3409 = vrot.lane.b32.xlu1 %v3395_v41, %s4074_s11 }
 0x539   :  { %3417 = vrot.lane.b32.xlu1 %v3396_v12, %s4075_s12 }
 0x589   :  { %v3400_v31 = vpop.permute.xlu0 %3399 }
 0x58a   :  { %v3421_v9 = vsel %vm633_vm2, %v3325_v59, %v3400_v31 }
 0x58d   :  { %v3408_v43 = vpop.permute.xlu0 %3407 }
 0x58e   :  { %v3424_v57 = vsel %vm3423_vm6, %v3421_v9, %v3408_v43 }
 0x591   :  { %v3416_v44 = vpop.permute.xlu0 %3415 }
 0x592   :  { %v3427_v21 = vsel %vm3426_vm7, %v3424_v57, %v3416_v44 }
 0x593   :  { %3866 = vmatprep.mubr.msk.f32.mxu0 %vm75_vm0, %v3427_v21 }
 0x5a3   :  { %v3402_v50 = vpop.permute.xlu1 %3401 }
 0x5a4   :  { %v3422_v46 = vsel %vm633_vm2, %v3393_v23, %v3402_v50 }
 0x5a7   :  { %v3410_v25 = vpop.permute.xlu1 %3409 }
 0x5a8   :  { %v3425_v47 = vsel %vm3423_vm6, %v3422_v46, %v3410_v25 }
 0x5ab   :  { %v3418_v15 = vpop.permute.xlu1 %3417 }
 0x5ac   :  { %v3428_v48 = vsel %vm3426_vm7, %v3425_v47, %v3418_v15 }
 0x5ad   :  { %3867 = vmatmul.mubr.msk.f32.vlgmr.msra.gmra.mrb[30].mxu0 %vm75_vm0, %v3428_v48 }
 0x680   :  { %v3868_v52 = vpop.f32.mrb[30].mxu0 }
 0x681   :  { %v3518_v53 = vadd.f32 %v3868_v52, %v3608_v34  ;;  %v3512_v55 = vpop.f32.mrb[31].mxu0 }
 0x682   :  { %v3513_v38 = vadd.f32 %v3608_v34, %v3512_v55 }
 0x683   :  { %3522 = vst.msk [vmem:[#allocation8 + $0x8] sm:$0xff] %vm75_vm0, %v3518_v53 }
 0x684   :  { %3521 = vst.msk [vmem:[#allocation8] sm:$0xff] %vm75_vm0, %v3513_v38 }
 0x685   :  { %4043 = shalt.err (!%p4040_p0)
}
 0x686   :  { %s4044_s18 = scalar_lea.hbm %s4711_s5, 256 }
 0x687   :  { %p4045_p1 = scmp.ne.s32.totalorder %s4711_s5, %s4044_s18  ;;  %p4048_p2 = scmp.lt.u32.totalorder %s4044_s18, %s4711_s5 }
 0x689   :  { %p4050_p3 = pnand %p4048_p2, %p4045_p1 }
 0x68b   :  { %4053 = shalt.err (!%p4050_p3)
}
 0x68c   :  { %3534 = dma.vmem_to_hbm [thread:$0]  %s3529_s16, 256, %s4711_s5, [#allocation4], %s4062_s30, %s4062_s30, %s4063_s6  }
 0x68d   :  { %4058 = dma.done.wait [#allocation4], 256  }
 0x68e   :  { %4059 = vsyncadd [#allocation4], 4294967040 }
 0x68f   :  { %3538 = vsyncpa [#allocation3], 1 }
 0x690   :  { %3539 = vsyncpa [#allocation6], 1 }
 0x691   :  { %3540 = vsyncpa [#allocation4], 1 }

</bundles_post_ra>
